<compile_context>
chip_gen: v7x
topology: tpu7x:2x2x1
jax: 0.10.0
libtpu: 0.0.40
codegen_flags: <defaults>
</compile_context>

<pallas_src>
import functools

import jax
import jax.numpy as jnp
from jax import lax
from jax.experimental import pallas as pl
from jax.experimental.pallas import tpu as pltpu


def _make_kernel(eps):
    def kernel(w2_ref, slab_ref, gamma_ref, beta_ref, o_ref):
        # w2_ref    : (Cout, K*K*Cin)       flattened conv weight
        # slab_ref  : (K*K*Cin, N*H*W)      im2col slab (spatial axis on lanes)
        # gamma_ref : (Cout, 1)             BatchNorm weight
        # beta_ref  : (Cout, 1)             BatchNorm bias
        # o_ref     : (Cout, N*H*W)
        #
        # Single MXU matmul covering all K*K taps (contraction = K*K*Cin).
        acc = jnp.dot(w2_ref[...], slab_ref[...],
                      preferred_element_type=jnp.float32)          # (Cout, M) f32

        # Training-mode BatchNorm over batch+spatial (axis=1), biased variance.
        # (Conv bias omitted: the batch-mean subtraction cancels it exactly.)
        mean = jnp.mean(acc, axis=1, keepdims=True)                 # (Cout, 1)
        var = jnp.mean((acc - mean) * (acc - mean), axis=1, keepdims=True)
        s = gamma_ref[...].astype(jnp.float32) * lax.rsqrt(var + eps)
        t = beta_ref[...].astype(jnp.float32) - mean * s

        # Fused scale + shift + ReLU, stored lane-dense (4 full vregs, unmasked vst).
        o_ref[...] = jnp.maximum(acc * s + t, 0.0).astype(o_ref.dtype)

    return kernel


@functools.partial(jax.jit, static_argnames=("kernel_size", "dilation_rate", "eps"))
def dilated_conv_block(x_nchw, weight, bias, gamma, beta,
                       kernel_size=3, dilation_rate=2, eps=1e-5):
    """Forward pass of DilatedConvBlock (Conv2d + train-mode BatchNorm2d + ReLU).

    x_nchw : (N, Cin, H, W)     — same convention as the PyTorch module
    weight : (Cout, Cin, K, K)  — nn.Conv2d weight layout
    bias   : (Cout,)            — nn.Conv2d bias (mathematically cancelled by BN)
    gamma  : (Cout,)            — BatchNorm2d weight
    beta   : (Cout,)            — BatchNorm2d bias
    returns: (N, Cout, H, W)

    Note: padding = dilation_rate gives 'same' spatial size only for kernel_size=3,
    which matches how the module is used here.
    """
    N, Cin, H, W = x_nchw.shape
    Cout = weight.shape[0]
    K = kernel_size
    d = dilation_rate
    pad = dilation_rate

    del bias  # cancelled exactly by training-mode BatchNorm's mean subtraction

    # --- im2col slab (tiny: (K*K*Cin) x (N*H*W) f32), built once in the wrapper ---
    x_pad = jnp.pad(x_nchw, ((0, 0), (0, 0), (pad, pad), (pad, pad)))
    patches = [
        lax.slice(x_pad, (0, 0, kh * d, kw * d), (N, Cin, kh * d + H, kw * d + W))
        for kh in range(K) for kw in range(K)
    ]                                                               # each (N, Cin, H, W)
    slab = jnp.stack(patches, axis=0)                               # (K*K, N, Cin, H, W)
    slab = slab.transpose(0, 2, 1, 3, 4).reshape(K * K * Cin, N * H * W)

    # Conv weight flattened to match the slab's (kh, kw, ci) row ordering.
    w2 = jnp.transpose(weight, (0, 2, 3, 1)).reshape(Cout, K * K * Cin)
    g2 = gamma.reshape(Cout, 1)
    b2 = beta.reshape(Cout, 1)

    vmem = pl.BlockSpec(memory_space=pltpu.MemorySpace.VMEM)
    # Single invocation: whole problem (~100 KB) fits comfortably in VMEM on all gens.
    # TODO(synk): for much larger N*H*W, tile the spatial axis on a grid (stats pass +
    # apply pass, or an "arbitrary" reduction axis with VMEM scratch) so v7x's two
    # TensorCores can both be used and VMEM stays within its 64 MiB budget.
    out = pl.pallas_call(
        _make_kernel(eps),
        out_shape=jax.ShapeDtypeStruct((Cout, N * H * W), jnp.float32),
        in_specs=[vmem] * 4,
        out_specs=vmem,
    )(w2, slab, g2, b2)

    # Channel-major kernel output -> NCHW.
    return jnp.transpose(out.reshape(Cout, N, H, W), (1, 0, 2, 3))


def _reference(x_nchw, weight, bias, gamma, beta, dilation, eps=1e-5):
    # Pure-JAX reference: conv_general_dilated + training-mode batchnorm + relu.
    conv = lax.conv_general_dilated(
        x_nchw.astype(jnp.float32), weight.astype(jnp.float32),
        window_strides=(1, 1),
        padding=((dilation, dilation), (dilation, dilation)),
        rhs_dilation=(dilation, dilation),
        dimension_numbers=("NCHW", "OIHW", "NCHW"),
    ) + bias.reshape(1, -1, 1, 1)
    mean = jnp.mean(conv, axis=(0, 2, 3), keepdims=True)
    var = jnp.mean((conv - mean) ** 2, axis=(0, 2, 3), keepdims=True)
    y = (conv - mean) * lax.rsqrt(var + eps)
    y = y * gamma.reshape(1, -1, 1, 1) + beta.reshape(1, -1, 1, 1)
    return jnp.maximum(y, 0.0)


if __name__ == "__main__":
    # Small deterministic setup consistent with the module:
    # in_channels=4, out_channels=8, kernel_size=3, dilation_rate=2, input (2, 4, 16, 16).
    N, Cin, H, W = 2, 4, 16, 16
    Cout, K, dil = 8, 3, 2

    key = jax.random.PRNGKey(0)
    kx, kw, kb, kg, kbe = jax.random.split(key, 5)

    x = jax.random.normal(kx, (N, Cin, H, W), dtype=jnp.float32)
    fan_in = Cin * K * K
    bound = 1.0 / (fan_in ** 0.5)
    weight = jax.random.uniform(kw, (Cout, Cin, K, K), jnp.float32, -bound, bound)
    bias = jax.random.uniform(kb, (Cout,), jnp.float32, -bound, bound)
    gamma = 1.0 + 0.1 * jax.random.normal(kg, (Cout,), jnp.float32)
    beta = 0.1 * jax.random.normal(kbe, (Cout,), jnp.float32)

    out = dilated_conv_block(x, weight, bias, gamma, beta,
                             kernel_size=K, dilation_rate=dil)
    out = jax.block_until_ready(out)

    ref = _reference(x, weight, bias, gamma, beta, dil)
    assert out.shape == (N, Cout, H, W), out.shape
    assert jnp.allclose(out, ref, atol=1e-4, rtol=1e-4), float(jnp.max(jnp.abs(out - ref)))

    print("KERNEL_OK")
</pallas_src>

<mosaic_0001>
module attributes {stable_mosaic.version = 11 : i64} {
  func.func @kernel(%arg0: memref<8x36xf32, #tpu.memory_space<vmem>>, %arg1: memref<36x512xf32, #tpu.memory_space<vmem>>, %arg2: memref<8x1xf32, #tpu.memory_space<vmem>>, %arg3: memref<8x1xf32, #tpu.memory_space<vmem>>, %arg4: memref<8x512xf32, #tpu.memory_space<vmem>>) attributes {dimension_semantics = [], scalar_prefetch = 0 : i64, scratch_operands = 0 : i64, tpu.core_type = #tpu.core_type<tc>} {
    %c0 = arith.constant 0 : index
    %c0_0 = arith.constant 0 : index
    %0 = vector.load %arg0[%c0, %c0_0] : memref<8x36xf32, #tpu.memory_space<vmem>>, vector<8x36xf32>
    %c0_1 = arith.constant 0 : index
    %c0_2 = arith.constant 0 : index
    %1 = vector.load %arg1[%c0_1, %c0_2] : memref<36x512xf32, #tpu.memory_space<vmem>>, vector<36x512xf32>
    %cst = arith.constant dense<0.000000e+00> : vector<8x512xf32>
    %2 = tpu.matmul %0, %1, %cst {dimension_numbers = #tpu.dot_dimension_numbers<[1], [0], [0], [1], [0, 0, 1, 1], [], []>} : vector<8x36xf32>, vector<36x512xf32>, vector<8x512xf32> -> vector<8x512xf32>
    %cst_3 = arith.constant dense<0.000000e+00> : vector<8xf32>
    %3 = vector.multi_reduction <add>, %2, %cst_3 [1] : vector<8x512xf32> to vector<8xf32>
    %4 = vector.shape_cast %3 : vector<8xf32> to vector<8x1xf32>
    %cst_4 = arith.constant 5.120000e+02 : f32
    %5 = vector.broadcast %cst_4 : f32 to vector<8x1xf32>
    %6 = arith.divf %4, %5 : vector<8x1xf32>
    %7 = vector.broadcast %6 : vector<8x1xf32> to vector<8x512xf32>
    %8 = arith.subf %2, %7 : vector<8x512xf32>
    %9 = vector.broadcast %6 : vector<8x1xf32> to vector<8x512xf32>
    %10 = arith.subf %2, %9 : vector<8x512xf32>
    %11 = arith.mulf %8, %10 : vector<8x512xf32>
    %cst_5 = arith.constant dense<0.000000e+00> : vector<8xf32>
    %12 = vector.multi_reduction <add>, %11, %cst_5 [1] : vector<8x512xf32> to vector<8xf32>
    %13 = vector.shape_cast %12 : vector<8xf32> to vector<8x1xf32>
    %cst_6 = arith.constant 5.120000e+02 : f32
    %14 = vector.broadcast %cst_6 : f32 to vector<8x1xf32>
    %15 = arith.divf %13, %14 : vector<8x1xf32>
    %c0_7 = arith.constant 0 : index
    %c0_8 = arith.constant 0 : index
    %16 = vector.load %arg2[%c0_7, %c0_8] : memref<8x1xf32, #tpu.memory_space<vmem>>, vector<8x1xf32>
    %cst_9 = arith.constant 9.99999974E-6 : f32
    %17 = vector.broadcast %cst_9 : f32 to vector<8x1xf32>
    %18 = arith.addf %15, %17 : vector<8x1xf32>
    %19 = math.rsqrt %18 : vector<8x1xf32>
    %20 = arith.mulf %16, %19 : vector<8x1xf32>
    %c0_10 = arith.constant 0 : index
    %c0_11 = arith.constant 0 : index
    %21 = vector.load %arg3[%c0_10, %c0_11] : memref<8x1xf32, #tpu.memory_space<vmem>>, vector<8x1xf32>
    %22 = arith.mulf %6, %20 : vector<8x1xf32>
    %23 = arith.subf %21, %22 : vector<8x1xf32>
    %24 = vector.broadcast %20 : vector<8x1xf32> to vector<8x512xf32>
    %25 = arith.mulf %2, %24 : vector<8x512xf32>
    %26 = vector.broadcast %23 : vector<8x1xf32> to vector<8x512xf32>
    %27 = arith.addf %25, %26 : vector<8x512xf32>
    %cst_12 = arith.constant 0.000000e+00 : f32
    %28 = vector.broadcast %cst_12 : f32 to vector<8x512xf32>
    %29 = arith.maximumf %27, %28 : vector<8x512xf32>
    %c0_13 = arith.constant 0 : index
    %c0_14 = arith.constant 0 : index
    %30 = vector.load %arg4[%c0_13, %c0_14] : memref<8x512xf32, #tpu.memory_space<vmem>>, vector<8x512xf32>
    tpu.vector_store %arg4[%c0_13, %c0_14], %29 {strides = array<i32>} : memref<8x512xf32, #tpu.memory_space<vmem>>, vector<8x512xf32>,
    return
  }
}

</mosaic_0001>

<bundles_post_ra>
// kernel: dilated_conv_block.1
= control target key start
LH: loop header
LB: loop body
LE: loop exit
PB: predicated region body
PF: predicated region fallthrough
CT: control target
= control target key end

     0   :  { %v283_v3 = vmov 0.0   ;;  %vm42_vm0 = vcmask 1043456   ;;  %vm38_vm1 = vcmask 293888   ;;  %v284_v50 = vmov 0   ;;  %s391_s1 = inlined_call_operand.vmem [shape: f32[36,512], index: 1, kind: input, shape index: {}]   ;;  %s392_s0 = inlined_call_operand.vmem [shape: f32[8,36], index: 0, kind: input, shape index: {}]   ;;  %s393_s2 = inlined_call_operand.vmem [shape: f32[8,1], index: 2, kind: input, shape index: {}]   ;;  %s394_s3 = inlined_call_operand.vmem [shape: f32[8,1], index: 3, kind: input, shape index: {}]   ;;  %s395_s4 = inlined_call_operand.vmem [shape: f32[8,512], index: 4, kind: output, shape index: {}]  }
   0x1   :  { %v19_v0 = vld [vmem:[%s391_s1 + $0x8] sm:$0xff]  ;;  %v18_v2 = vld [vmem:[%s391_s1] sm:$0xff]  ;;  %119 = vmatprep.mubr.f32.mxu0 %v283_v3  ;;  %190 = vmatprep.mubr.f32.mxu1 %v283_v3  ;;  %v21_v6 = vld [vmem:[%s391_s1 + $0x18] sm:$0xff] }
   0x2   :  { %v23_v1 = vld [vmem:[%s391_s1 + $0x28] sm:$0xff]  ;;  %v22_v5 = vld [vmem:[%s391_s1 + $0x20] sm:$0xff]  ;;  %v25_v7 = vld [vmem:[%s391_s1 + $0x38] sm:$0xff]  ;;  %279 = vset.pattern.permute.xlu1 %v284_v50  ;;  %280 = vset.pattern.permute.xlu0 %v284_v50 }
   0x3   :  { %v261_v4 = vpack.c.bf16 %v23_v1, %v19_v0  ;;  %v263_v8 = vpack.c.bf16 %v22_v5, %v18_v2  ;;  %v269_v9 = vpack.c.bf16 %v25_v7, %v21_v6  ;;  %v20_v10 = vld [vmem:[%s391_s1 + $0x10] sm:$0xff]  ;;  %v27_v12 = vld [vmem:[%s391_s1 + $0x48] sm:$0xff]  ;;  %v26_v15 = vld [vmem:[%s391_s1 + $0x40] sm:$0xff] }
   0x4   :  { %v24_v11 = vld [vmem:[%s391_s1 + $0x30] sm:$0xff]  ;;  %v31_v14 = vld [vmem:[%s391_s1 + $0x68] sm:$0xff]  ;;  %v30_v16 = vld [vmem:[%s391_s1 + $0x60] sm:$0xff] }
   0x5   :  { %262 = vmatprep.subr.bf16.mxu0 %v261_v4  ;;  %v271_v13 = vpack.c.bf16 %v24_v11, %v20_v10  ;;  %270 = vmatprep.subr.bf16.mxu1 %v269_v9  ;;  %v265_v17 = vpack.c.bf16 %v31_v14, %v27_v12  ;;  %v267_v18 = vpack.c.bf16 %v30_v16, %v26_v15  ;;  %v29_v19 = vld [vmem:[%s391_s1 + $0x58] sm:$0xff]  ;;  %v28_v21 = vld [vmem:[%s391_s1 + $0x50] sm:$0xff]  ;;  %v35_v25 = vld [vmem:[%s391_s1 + $0x88] sm:$0xf] }
   0x6   :  { %264 = vmatpush1.bf16.msra.mxu0 %v263_v8  ;;  %v33_v20 = vld [vmem:[%s391_s1 + $0x78] sm:$0xff]  ;;  %v32_v23 = vld [vmem:[%s391_s1 + $0x70] sm:$0xff]  ;;  %v34_v27 = vld [vmem:[%s391_s1 + $0x80] sm:$0xf] }
   0x7   :  { %272 = vmatpush1.bf16.msra.mxu1 %v271_v13  ;;  %v273_v22 = vpack.c.bf16 %v33_v20, %v29_v19  ;;  %266 = vmatprep.subr.bf16.mxu0 %v265_v17  ;;  %v275_v24 = vpack.c.bf16 %v32_v23, %v28_v21  ;;  %v37_v26 = vld [vmem:[%s391_s1 + $0x98] sm:$0xf]  ;;  %v17_v28 = vld [vmem:[%s392_s0] sm:$0xff]  ;;  %v36_v29 = vld [vmem:[%s391_s1 + $0x90] sm:$0xf] }
   0x8   :  { %v218_v54 = vld [vmem:[%s393_s2] sm:$0xff] }
   0x9   :  { %274 = vmatprep.subr.bf16.mxu1 %v273_v22  ;;  %v222_v57 = vld [vmem:[%s394_s3] sm:$0xff] }
   0xa   :  { %268 = vmatpush1.bf16.msra.mxu0 %v267_v18 }
   0xb   :  { %276 = vmatpush1.bf16.msra.mxu1 %v275_v24  ;;  %255 = vmatprep.subr.msk.mxu0 %vm42_vm0, %v35_v25 }
   0xc   :  { %258 = vmatprep.subr.msk.mxu1 %vm42_vm0, %v37_v26 }
   0xe   :  { %256 = vmatpush1.msk.msra.mxu0 %vm42_vm0, %v34_v27 }
   0xf   :  { %257 = vmatmul.mubr.msk.f32.vlgmr.msra.gmra.mrb[0].mxu0 %vm38_vm1, %v17_v28  ;;  %259 = vmatpush1.msk.msra.mxu1 %vm42_vm0, %v36_v29 }
  0x10   :  { %260 = vmatmul.mubr.msk.f32.vlgmr.msra.gmra.mrb[0].mxu1 %vm38_vm1, %v17_v28 }
  0xe2   :  { %v121_v30 = vpop.f32.mrb[0].mxu0 }
  0xe3   :  { %v123_v31 = vpop.f32.mrb[1].mxu0  ;;  %v192_v32 = vpop.f32.mrb[0].mxu1 }
  0xe4   :  { %v197_v33 = vadd.f32 %v123_v31, %v121_v30  ;;  %v194_v34 = vpop.f32.mrb[1].mxu1 }
  0xe6   :  { %v198_v35 = vadd.f32 %v197_v33, %v192_v32 }
  0xe8   :  { %v199_v36 = vadd.f32 %v198_v35, %v194_v34 }
  0xea   :  { %200 = vadd.xlane.f32.xlu0 %v199_v36 }
 0x177   :  { %v201_v37 = vpop.xlane.xlu0 %200 }
 0x178   :  { %v203_v38 = vmul.f32 0.001953125, %v201_v37 }
 0x17a   :  { %v204_v39 = vsub.f32 %v121_v30, %v203_v38  ;;  %v205_v40 = vsub.f32 %v123_v31, %v203_v38  ;;  %v206_v41 = vsub.f32 %v192_v32, %v203_v38  ;;  %v207_v42 = vsub.f32 %v194_v34, %v203_v38 }
 0x17c   :  { %v208_v43 = vmul.f32 %v204_v39, %v204_v39  ;;  %v209_v44 = vmul.f32 %v205_v40, %v205_v40  ;;  %v210_v45 = vmul.f32 %v206_v41, %v206_v41  ;;  %v211_v47 = vmul.f32 %v207_v42, %v207_v42 }
 0x17e   :  { %v212_v46 = vadd.f32 %v209_v44, %v208_v43 }
 0x180   :  { %v213_v48 = vadd.f32 %v212_v46, %v210_v45 }
 0x182   :  { %v214_v49 = vadd.f32 %v213_v48, %v211_v47 }
 0x184   :  { %215 = vadd.xlane.f32.xlu0 %v214_v49 }
 0x211   :  { %v216_v51 = vpop.xlane.xlu0 %215 }
 0x212   :  { %v217_v52 = vmul.f32 0.001953125, %v216_v51 }
 0x214   :  { %v219_v53 = vadd.f32 1e-05, %v217_v52 }
 0x216   :  { %281 = vrsqrt.f32 %v219_v53 }
 0x220   :  { %v282_v55 = vpop.eup %281 }
 0x221   :  { %v221_v56 = vmul.f32 %v282_v55, %v218_v54 }
 0x223   :  { %227 = vperm.xlu1 %279, %v221_v56   ;;  %v223_v58 = vmul.f32 %v221_v56, %v203_v38 }
 0x225   :  { %v224_v59 = vsub.f32 %v222_v57, %v223_v58 }
 0x227   :  { %236 = vperm.xlu1 %279, %v224_v59  }
 0x2a2   :  { %v228_v60 = vpop.permute.xlu1 %227 }
 0x2a3   :  { %v230_v61 = vmul.f32 %v228_v60, %v121_v30  ;;  %v231_v62 = vmul.f32 %v228_v60, %v123_v31  ;;  %v232_v63 = vmul.f32 %v228_v60, %v192_v32  ;;  %v233_v0 = vmul.f32 %v228_v60, %v194_v34 }
 0x2a6   :  { %v237_v1 = vpop.permute.xlu1 %236 }
 0x2a7   :  { %v239_v2 = vadd.f32 %v237_v1, %v230_v61  ;;  %v240_v3 = vadd.f32 %v237_v1, %v231_v62  ;;  %v241_v4 = vadd.f32 %v237_v1, %v232_v63  ;;  %v242_v5 = vadd.f32 %v237_v1, %v233_v0 }
 0x2a9   :  { %v243_v6 = vmax.f32 %v239_v2, 0.0  ;;  %v244_v7 = vmax.f32 %v240_v3, 0.0  ;;  %v245_v8 = vmax.f32 %v241_v4, 0.0  ;;  %v246_v9 = vmax.f32 %v242_v5, 0.0 }
 0x2ab   :  { %247 = vst [vmem:[%s395_s4] sm:$0xff] %v243_v6  ;;  %248 = vst [vmem:[%s395_s4 + $0x8] sm:$0xff] %v244_v7 }
 0x2ac   :  { %249 = vst [vmem:[%s395_s4 + $0x10] sm:$0xff] %v245_v8  ;;  %250 = vst [vmem:[%s395_s4 + $0x18] sm:$0xff] %v246_v9 }

</bundles_post_ra>
